<compile_context>
chip_gen: v7x
topology: tpu7x:2x2x1
jax: 0.10.0
libtpu: 0.0.40
codegen_flags: <defaults>
</compile_context>

<pallas_src>
import functools

import jax
import jax.numpy as jnp
from jax.experimental import pallas as pl
from jax.experimental.pallas import tpu as pltpu


@functools.lru_cache(maxsize=None)
def _roll_is_forward() -> bool:
    """One-time probe of pltpu.roll's shift convention on this backend.

    Returns True iff pltpu.roll(x, s, axis) == jnp.roll(x, s, axis) (elements
    move toward higher indices).  The TV kernel picks its boundary masks from
    this flag, so it is correct under either convention / across JAX versions.
    Runs a tiny eager pallas_call; call it outside jit.
    """

    def probe(x_ref, o_ref):
        o_ref[...] = pltpu.roll(x_ref[...], 1, axis=0)

    x = jnp.broadcast_to(jnp.arange(8, dtype=jnp.float32)[:, None], (8, 128))
    out = pl.pallas_call(
        probe, out_shape=jax.ShapeDtypeStruct((8, 128), jnp.float32)
    )(x)
    # jnp.roll semantics => out[1, :] == x[0, :] == 0
    return bool(out[1, 0] == 0.0)


def _make_tv_kernel(h, w, wp, tb, acc_rows, roll_forward):
    """Kernel for one (tb, h, wp) block of lane-packed planes."""
    rows = tb * h  # the block is processed as a 2-D (rows, wp) slab

    def kernel(x_ref, hpart_ref, wpart_ref):
        step = pl.program_id(1)

        # Zero this chunk's partial-sum accumulators at its first step.
        @pl.when(step == 0)
        def _():
            hpart_ref[...] = jnp.zeros_like(hpart_ref)
            wpart_ref[...] = jnp.zeros_like(wpart_ref)

        # Whole packed planes -> 2-D slab (free reshape: h % 8 == 0 whenever
        # tb > 1), computed in f32 for a stable reduction.
        x = x_ref[...].reshape(rows, wp).astype(jnp.float32)

        def fold(d2):
            # (rows, wp) -> (1, acc_rows, wp) using leading-axis (pure VPU)
            # adds only; the full cross-lane/sublane reduction happens exactly
            # once, in the JAX wrapper.
            return d2.reshape(rows // acc_rows, acc_rows, wp).sum(
                axis=0, keepdims=True
            )

        if h > 1:
            # Neighbouring row via an XLU sublane rotate; mask the per-plane
            # boundary row (covers the block wrap-around as well).
            nxt = pltpu.roll(x, rows - 1, axis=0)
            rpos = jax.lax.broadcasted_iota(jnp.int32, (tb, h, wp), 1).reshape(
                rows, wp
            )
            keep = (rpos != h - 1) if roll_forward else (rpos != 0)
            dh = jnp.where(keep, nxt - x, 0.0)
            hpart_ref[...] += fold(dh * dh)

        if w > 1:
            # Neighbouring column via an XLU lane rotate; mask the wrap column
            # and the seams between lane-packed planes.
            nxt = pltpu.roll(x, wp - 1, axis=1)
            cpos = jax.lax.broadcasted_iota(jnp.int32, (rows, wp), 1)
            if wp != w:  # lane-packed: position within the original plane
                cpos = cpos % w
            keep = (cpos != w - 1) if roll_forward else (cpos != 0)
            dw = jnp.where(keep, nxt - x, 0.0)
            wpart_ref[...] += fold(dw * dw)

    return kernel


def l_tv_pallas(x, tv_loss_weight=1.0):
    """TV loss matching PyTorch L_TV.forward.  x: (B, C, H, W) -> f32 scalar."""
    b, c, h, w = x.shape
    # Note: PyTorch divides by batch_size = B (not B*C); we match that exactly.
    count_h = (h - 1) * w
    count_w = h * (w - 1)
    bc = b * c

    planes = x.reshape(bc, h, w)

    # ---- lane-dense packing: G planes side by side along the lane axis -------
    g = 1
    if w < 128:
        g_cap = max(1, 128 // w)
        for cand in range(min(g_cap, bc), 0, -1):
            if bc % cand == 0:
                g = cand
                break
    if g > 1:
        planes = (
            planes.reshape(bc // g, g, h, w)
            .transpose(0, 2, 1, 3)
            .reshape(bc // g, h, g * w)
        )
    n_planes, _, wp = planes.shape

    # ---- block sizing: whole packed planes per step, ~2 MiB per input block --
    # TODO(synk): tile H (with a one-row halo) for very large planes that exceed
    # this per-block VMEM budget on their own.
    plane_bytes = h * wp * x.dtype.itemsize
    target_block_bytes = 2 * 1024 * 1024
    tb_cap = max(1, int(target_block_bytes // plane_bytes))
    tb = 1
    for cand in range(min(tb_cap, n_planes), 0, -1):
        if n_planes % cand == 0:
            tb = cand
            break
    if h % 8 != 0:
        tb = 1  # keep the in-kernel (tb, h, wp) -> (tb*h, wp) reshape layout-free
    steps_total = n_planes // tb

    # Split the steps into independent chunks so the two v7x TensorCores can run
    # half each ("parallel" axis); a size-1 axis on single-core chips is free.
    num_chunks = 2 if (steps_total >= 2 and steps_total % 2 == 0) else 1
    steps = steps_total // num_chunks

    # vreg-shaped partial accumulators (8 sublanes whenever H allows it).
    acc_rows = 8 if h % 8 == 0 else h

    kernel = _make_tv_kernel(h, w, wp, tb, acc_rows, _roll_is_forward())

    part_shape = jax.ShapeDtypeStruct((num_chunks, acc_rows, wp), jnp.float32)
    h_part, w_part = pl.pallas_call(
        kernel,
        out_shape=(part_shape, part_shape),
        grid=(num_chunks, steps),
        in_specs=[
            pl.BlockSpec((tb, h, wp), lambda ci, si: (ci * steps + si, 0, 0)),
        ],
        out_specs=(
            pl.BlockSpec((1, acc_rows, wp), lambda ci, si: (ci, 0, 0)),
            pl.BlockSpec((1, acc_rows, wp), lambda ci, si: (ci, 0, 0)),
        ),
        compiler_params=pltpu.CompilerParams(
            dimension_semantics=("parallel", "arbitrary"),
            vmem_limit_bytes=32 * 1024 * 1024,
        ),
    )(planes)

    # Scalar epilogue in plain JAX, off the kernel's critical path.
    h_tv = jnp.sum(h_part)
    w_tv = jnp.sum(w_part)
    out = tv_loss_weight * (h_tv / count_h + w_tv / count_w) / b
    return out.astype(jnp.float32)


def l_tv_reference(x, tv_loss_weight=1.0):
    b, _, h, w = x.shape
    count_h = (h - 1) * w
    count_w = h * (w - 1)
    xf = x.astype(jnp.float32)
    h_tv = jnp.sum((xf[:, :, 1:, :] - xf[:, :, : h - 1, :]) ** 2)
    w_tv = jnp.sum((xf[:, :, :, 1:] - xf[:, :, :, : w - 1]) ** 2)
    return tv_loss_weight * (h_tv / count_h + w_tv / count_w) / b


if __name__ == "__main__":
    key = jax.random.PRNGKey(0)

    # Primary small shape implied by the module (NCHW).
    x = jax.random.normal(key, (2, 4, 16, 16), dtype=jnp.float32)
    out = jax.block_until_ready(l_tv_pallas(x, tv_loss_weight=1.0))
    ref = l_tv_reference(x, tv_loss_weight=1.0)
    assert jnp.allclose(out, ref, rtol=5e-5, atol=1e-6), (out, ref)

    # Larger shape exercising multi-plane blocks, the multi-step grid and the
    # two-chunk (dual TensorCore on v7x) partial sums.
    x2 = jax.random.normal(jax.random.PRNGKey(0), (4, 4, 512, 256), jnp.float32)
    out2 = jax.block_until_ready(l_tv_pallas(x2, tv_loss_weight=0.5))
    ref2 = l_tv_reference(x2, tv_loss_weight=0.5)
    assert jnp.allclose(out2, ref2, rtol=5e-5, atol=1e-6), (out2, ref2)

    print("KERNEL_OK")
</pallas_src>

<mosaic_0001>
module attributes {stable_mosaic.version = 11 : i64} {
  func.func @probe(%arg0: memref<8x128xf32, #tpu.memory_space<vmem>>, %arg1: memref<8x128xf32, #tpu.memory_space<vmem>>) attributes {dimension_semantics = [], scalar_prefetch = 0 : i64, scratch_operands = 0 : i64, tpu.core_type = #tpu.core_type<tc>} {
    %c0 = arith.constant 0 : index
    %c0_0 = arith.constant 0 : index
    %0 = vector.load %arg0[%c0, %c0_0] : memref<8x128xf32, #tpu.memory_space<vmem>>, vector<8x128xf32>
    %c1_i32 = arith.constant 1 : i32
    %1 = tpu.dynamic_rotate %0 by %c1_i32 dim 0 : vector<8x128xf32>, i32 -> vector<8x128xf32>
    %c0_1 = arith.constant 0 : index
    %c0_2 = arith.constant 0 : index
    %2 = vector.load %arg1[%c0_1, %c0_2] : memref<8x128xf32, #tpu.memory_space<vmem>>, vector<8x128xf32>
    tpu.vector_store %arg1[%c0_1, %c0_2], %1 {strides = array<i32>} : memref<8x128xf32, #tpu.memory_space<vmem>>, vector<8x128xf32>,
    return
  }
}

</mosaic_0001>

<bundles_post_ra>
// kernel: tpu_custom_call.1
= control target key start
LH: loop header
LB: loop body
LE: loop exit
PB: predicated region body
PF: predicated region fallthrough
CT: control target
= control target key end

     0   :  { %6 = vsyncpa [#allocation3], 0  ;;  %s125_s0 = inlined_call_operand.hbm [shape: f32[8,128], index: 0, kind: input, shape index: {}]   ;;  %s126_s1 = inlined_call_operand.hbm [shape: f32[8,128], index: 1, kind: output, shape index: {}]  }
   0x1   :  { %7 = vsyncpa [#allocation4], 0  ;;  %s89_s6 = smov [#allocation2]   ;;  %s41_s10 = scalar_lea.hbm %s125_s0, 128 }
   0x2   :  { %s14_s7 = sshll.u32 %s89_s6, 4  ;;  %p42_p0 = scmp.ne.s32.totalorder %s125_s0, %s41_s10  ;;  %s15_s7 = int_to_ptr.vmem [resolvable:$true] %s14_s7 }
   0x3   :  { %p45_p1 = scmp.lt.u32.totalorder %s41_s10, %s125_s0 }
   0x5   :  { %p47_p2 = pnand %p45_p1, %p42_p0 }
   0x7   :  { %50 = shalt.err (!%p47_p2)
}
   0x8   :  { %s51_s15 = scalar_lea.vmem %s15_s7, 128  ;;  %p56_p4 = scmp.lt.s32.totalorder %s15_s7, %s15_s7 }
   0x9   :  { %p52_p3 = scmp.ne.s32.totalorder %s15_s7, %s51_s15  ;;  %p57_p5 = scmp.lt.s32.totalorder %s51_s15, %s51_s15 }
   0xb   :  { %p58_p6 = por %p57_p5, %p56_p4 }
   0xd   :  { %p59_p7 = pnand %p58_p6, %p52_p3 }
   0xf   :  { %62 = shalt.err (!%p59_p7)
}
  0x10   :  { %17 = dma.hbm_to_vmem [thread:$0]  %s125_s0, 128, %s15_s7, [#allocation3]  }
  0x11   :  { %85 = dma.done.wait [#allocation3], 128  }
  0x12   :  { %86 = vsyncadd [#allocation3], 4294967168  ;;  %s90_s18 = smov [#allocation5]   ;;  %v21_v0 = vld [vmem:[#allocation2] sm:$0xff] }
  0x13   :  { %s30_s19 = sshll.u32 %s90_s18, 4  ;;  %v22_v1 = vrot.slane %v21_v0, 7  ;;  %s31_s19 = int_to_ptr.vmem [resolvable:$true] %s30_s19 }
  0x14   :  { %s63_s20 = scalar_lea.vmem %s31_s19, 128  ;;  %p68_p9 = scmp.lt.s32.totalorder %s31_s19, %s31_s19 }
  0x15   :  { %23 = vst [vmem:[#allocation5] sm:$0xff] %v22_v1  ;;  %p64_p8 = scmp.ne.s32.totalorder %s31_s19, %s63_s20  ;;  %p69_p10 = scmp.lt.s32.totalorder %s63_s20, %s63_s20 }
  0x17   :  { %p70_p11 = por %p69_p10, %p68_p9 }
  0x19   :  { %p71_p12 = pnand %p70_p11, %p64_p8 }
  0x1b   :  { %74 = shalt.err (!%p71_p12)
}
  0x1c   :  { %s75_s23 = scalar_lea.hbm %s126_s1, 128 }
  0x1d   :  { %p76_p13 = scmp.ne.s32.totalorder %s126_s1, %s75_s23  ;;  %p79_p0 = scmp.lt.u32.totalorder %s75_s23, %s126_s1 }
  0x1f   :  { %p81_p1 = pnand %p79_p0, %p76_p13 }
  0x21   :  { %84 = shalt.err (!%p81_p1)
}
  0x22   :  { %33 = dma.vmem_to_hbm [thread:$0]  %s31_s19, 128, %s126_s1, [#allocation4]  }
  0x23   :  { %87 = dma.done.wait [#allocation4], 128  }
  0x24   :  { %88 = vsyncadd [#allocation4], 4294967168 }
  0x25   :  { %37 = vsyncpa [#allocation3], 1 }
  0x26   :  { %38 = vsyncpa [#allocation4], 1 }

</bundles_post_ra>
